<compile_context>
chip_gen: v5e
topology: v5e:2x2
jax: 0.10.0
libtpu: 0.0.40
codegen_flags: <defaults>
</compile_context>

<pallas_src>
import functools

import jax
import jax.numpy as jnp
from jax.experimental import pallas as pl
from jax.experimental.pallas import tpu as pltpu

_LANE = 128
_SUBLANE = 8


def _round_up(v, m):
    return (v + m - 1) // m * m


def _sage_lin_skip_kernel(x_ref, adj_ref,
                          w1_ref, b1_ref,
                          w2_ref, b2_ref,
                          wlin_ref, blin_ref,
                          out_ref, *, num_classes):
    x = x_ref[...]                  # [Np, Fp] f32 (zero-padded)
    a = adj_ref[...]                # [Np, Np] row-normalized (mean) adjacency

    # ---- SAGEConv 1: one fused matmul for neighbor+root linears, then ReLU ----
    agg1 = jnp.dot(a, x, preferred_element_type=jnp.float32)             # MXU
    z1 = jnp.concatenate([agg1, x], axis=-1)                             # [Np, 2*Fp]
    h1 = jnp.dot(z1, w1_ref[...], preferred_element_type=jnp.float32) + b1_ref[...]
    h1 = jnp.maximum(h1, 0.0)                                            # ReLU

    # F.dropout(training=False) -> identity (eval semantics).

    # ---- SAGEConv 2 ------------------------------------------------------------
    agg2 = jnp.dot(a, h1, preferred_element_type=jnp.float32)
    z2 = jnp.concatenate([agg2, h1], axis=-1)                            # [Np, 2*Hp]
    h2 = jnp.dot(z2, w2_ref[...], preferred_element_type=jnp.float32) + b2_ref[...]

    h = h1 + h2                                                          # skip

    # ---- Linear head + masked log_softmax over valid class lanes ---------------
    logits = (jnp.dot(h, wlin_ref[...], preferred_element_type=jnp.float32)
              + blin_ref[...])                                           # [Np, Cp]
    col = jax.lax.broadcasted_iota(jnp.int32, logits.shape, 1)
    valid = col < num_classes
    neg = jnp.float32(-1e30)
    lm = jnp.where(valid, logits, neg)
    m = jnp.max(lm, axis=-1, keepdims=True)
    z = jnp.where(valid, jnp.exp(lm - m), 0.0)
    lse = jnp.log(jnp.sum(z, axis=-1, keepdims=True)) + m
    out_ref[...] = (lm - lse).astype(out_ref.dtype)


def edge_index_to_mean_adj(edge_index, num_nodes_padded):
    """Row-normalized dense adjacency A[target, source] (mean aggregation,
    no self loops - PyG SAGEConv default). Isolated rows stay all-zero."""
    src = edge_index[0]
    dst = edge_index[1]
    adj = jnp.zeros((num_nodes_padded, num_nodes_padded), jnp.float32)
    adj = adj.at[dst, src].add(1.0)                  # duplicates counted, like mean aggr
    deg = jnp.sum(adj, axis=1, keepdims=True)
    return adj / jnp.maximum(deg, 1.0)


def _pad2(w, rows, cols):
    out = jnp.zeros((rows, cols), jnp.float32)
    return out.at[:w.shape[0], :w.shape[1]].set(w.astype(jnp.float32))


def _stack_neigh_root(w_neigh, w_root, in_pad, out_pad):
    """[W_neigh; W_root] stacked along the contraction dim, each zero-padded."""
    top = _pad2(w_neigh, in_pad, out_pad)
    bot = _pad2(w_root, in_pad, out_pad)
    return jnp.concatenate([top, bot], axis=0)       # [2*in_pad, out_pad]


def sage_lin_skip_forward(params, data):
    x, edge_index = data
    n, f_in = x.shape
    hidden = params["conv1"]["w_neigh"].shape[1]
    num_classes = params["linear"]["w"].shape[1]

    # Pad the node dim to a lane multiple so the [Np,Np] adjacency contraction
    # and the output store are fully lane-dense tiles.
    np_ = max(_round_up(n, _LANE), _LANE)
    fp = _round_up(f_in, _LANE)
    hp = _round_up(hidden, _LANE)
    cp = _round_up(num_classes, _LANE)

    x_p = _pad2(x, np_, fp)
    adj = edge_index_to_mean_adj(edge_index, np_)

    p1, p2, plin = params["conv1"], params["conv2"], params["linear"]
    args = (
        x_p, adj,
        _stack_neigh_root(p1["w_neigh"], p1["w_root"], fp, hp), _pad2(p1["bias"], 1, hp),
        _stack_neigh_root(p2["w_neigh"], p2["w_root"], hp, hp), _pad2(p2["bias"], 1, hp),
        _pad2(plin["w"], hp, cp), _pad2(plin["bias"], 1, cp),
    )

    kernel = functools.partial(_sage_lin_skip_kernel, num_classes=num_classes)
    vmem = pl.BlockSpec(memory_space=pltpu.MemorySpace.VMEM)
    out_p = pl.pallas_call(
        kernel,
        out_shape=jax.ShapeDtypeStruct((np_, cp), jnp.float32),
        in_specs=[vmem] * len(args),
        out_specs=vmem,
        compiler_params=pltpu.CompilerParams(vmem_limit_bytes=64 << 20),
    )(*args)

    return out_p[:n, :num_classes], edge_index


def init_params(key, num_features, hidden_units, num_classes):
    ks = jax.random.split(key, 6)

    def lin(k, fan_in, fan_out):
        s = float(fan_in) ** -0.5
        return jax.random.uniform(k, (fan_in, fan_out), jnp.float32, -s, s)

    return {
        "conv1": {"w_neigh": lin(ks[0], num_features, hidden_units),
                  "w_root": lin(ks[1], num_features, hidden_units),
                  "bias": jnp.zeros((1, hidden_units), jnp.float32)},
        "conv2": {"w_neigh": lin(ks[2], hidden_units, hidden_units),
                  "w_root": lin(ks[3], hidden_units, hidden_units),
                  "bias": jnp.zeros((1, hidden_units), jnp.float32)},
        "linear": {"w": lin(ks[4], hidden_units, num_classes),
                   "bias": lin(ks[5], hidden_units, num_classes)[:1, :]},
    }


def _ref_forward(params, x, edge_index):
    """Pure-JAX reference with identical math (eval semantics)."""
    n = x.shape[0]
    src, dst = edge_index[0], edge_index[1]
    adj = jnp.zeros((n, n), jnp.float32).at[dst, src].add(1.0)
    a = adj / jnp.maximum(jnp.sum(adj, axis=1, keepdims=True), 1.0)

    def conv(p, h):
        return a @ h @ p["w_neigh"] + h @ p["w_root"] + p["bias"]

    h1 = jax.nn.relu(conv(params["conv1"], x))
    h2 = conv(params["conv2"], h1)
    h = h1 + h2
    logits = h @ params["linear"]["w"] + params["linear"]["bias"]
    return jax.nn.log_softmax(logits, axis=-1)


if __name__ == "__main__":
    num_nodes = 16
    num_features = 8
    hidden_units = 32
    num_classes = 4

    key = jax.random.PRNGKey(0)
    kx, kp = jax.random.split(key)

    x = jax.random.normal(kx, (num_nodes, num_features), jnp.float32)

    # deterministic ring graph (both directions): 32 edges
    idx = jnp.arange(num_nodes, dtype=jnp.int32)
    src = jnp.concatenate([idx, (idx + 1) % num_nodes])
    dst = jnp.concatenate([(idx + 1) % num_nodes, idx])
    edge_index = jnp.stack([src, dst], axis=0)          # [2, 32]

    params = init_params(kp, num_features, hidden_units, num_classes)

    out, ei = sage_lin_skip_forward(params, (x, edge_index))
    jax.block_until_ready(out)

    assert out.shape == (num_nodes, num_classes)
    assert ei.shape == edge_index.shape
    # log_softmax rows must exponentiate to a probability distribution
    row_sums = jnp.sum(jnp.exp(out), axis=-1)
    assert bool(jnp.all(jnp.abs(row_sums - 1.0) < 1e-4))
    assert bool(jnp.all(jnp.isfinite(out)))
    # match the pure-JAX reference
    ref = _ref_forward(params, x, edge_index)
    assert bool(jnp.all(jnp.abs(out - ref) < 1e-4))
    print("KERNEL_OK")
</pallas_src>

<mosaic_0001>
module attributes {stable_mosaic.version = 11 : i64} {
  func.func @_sage_lin_skip_kernel(%arg0: memref<128x128xf32, #tpu.memory_space<vmem>>, %arg1: memref<128x128xf32, #tpu.memory_space<vmem>>, %arg2: memref<256x128xf32, #tpu.memory_space<vmem>>, %arg3: memref<1x128xf32, #tpu.memory_space<vmem>>, %arg4: memref<256x128xf32, #tpu.memory_space<vmem>>, %arg5: memref<1x128xf32, #tpu.memory_space<vmem>>, %arg6: memref<128x128xf32, #tpu.memory_space<vmem>>, %arg7: memref<1x128xf32, #tpu.memory_space<vmem>>, %arg8: memref<128x128xf32, #tpu.memory_space<vmem>>) attributes {dimension_semantics = [], scalar_prefetch = 0 : i64, scratch_operands = 0 : i64, tpu.core_type = #tpu.core_type<tc>} {
    %c0 = arith.constant 0 : index
    %c0_0 = arith.constant 0 : index
    %0 = vector.load %arg0[%c0, %c0_0] : memref<128x128xf32, #tpu.memory_space<vmem>>, vector<128x128xf32>
    %c0_1 = arith.constant 0 : index
    %c0_2 = arith.constant 0 : index
    %1 = vector.load %arg1[%c0_1, %c0_2] : memref<128x128xf32, #tpu.memory_space<vmem>>, vector<128x128xf32>
    %cst = arith.constant dense<0.000000e+00> : vector<128x128xf32>
    %2 = tpu.matmul %1, %0, %cst {dimension_numbers = #tpu.dot_dimension_numbers<[1], [0], [0], [1], [0, 0, 1, 1], [], []>} : vector<128x128xf32>, vector<128x128xf32>, vector<128x128xf32> -> vector<128x128xf32>
    %3 = tpu.concatenate %2, %0 in 1 : vector<128x128xf32>, vector<128x128xf32> -> vector<128x256xf32>
    %c0_3 = arith.constant 0 : index
    %c0_4 = arith.constant 0 : index
    %4 = vector.load %arg2[%c0_3, %c0_4] : memref<256x128xf32, #tpu.memory_space<vmem>>, vector<256x128xf32>
    %cst_5 = arith.constant dense<0.000000e+00> : vector<128x128xf32>
    %5 = tpu.matmul %3, %4, %cst_5 {dimension_numbers = #tpu.dot_dimension_numbers<[1], [0], [0], [1], [0, 0, 1, 1], [], []>} : vector<128x256xf32>, vector<256x128xf32>, vector<128x128xf32> -> vector<128x128xf32>
    %c0_6 = arith.constant 0 : index
    %c0_7 = arith.constant 0 : index
    %6 = vector.load %arg3[%c0_6, %c0_7] : memref<1x128xf32, #tpu.memory_space<vmem>>, vector<1x128xf32>
    %7 = vector.broadcast %6 : vector<1x128xf32> to vector<128x128xf32>
    %8 = arith.addf %5, %7 : vector<128x128xf32>
    %cst_8 = arith.constant 0.000000e+00 : f32
    %9 = vector.broadcast %cst_8 : f32 to vector<128x128xf32>
    %10 = arith.maximumf %8, %9 : vector<128x128xf32>
    %cst_9 = arith.constant dense<0.000000e+00> : vector<128x128xf32>
    %11 = tpu.matmul %1, %10, %cst_9 {dimension_numbers = #tpu.dot_dimension_numbers<[1], [0], [0], [1], [0, 0, 1, 1], [], []>} : vector<128x128xf32>, vector<128x128xf32>, vector<128x128xf32> -> vector<128x128xf32>
    %12 = tpu.concatenate %11, %10 in 1 : vector<128x128xf32>, vector<128x128xf32> -> vector<128x256xf32>
    %c0_10 = arith.constant 0 : index
    %c0_11 = arith.constant 0 : index
    %13 = vector.load %arg4[%c0_10, %c0_11] : memref<256x128xf32, #tpu.memory_space<vmem>>, vector<256x128xf32>
    %cst_12 = arith.constant dense<0.000000e+00> : vector<128x128xf32>
    %14 = tpu.matmul %12, %13, %cst_12 {dimension_numbers = #tpu.dot_dimension_numbers<[1], [0], [0], [1], [0, 0, 1, 1], [], []>} : vector<128x256xf32>, vector<256x128xf32>, vector<128x128xf32> -> vector<128x128xf32>
    %c0_13 = arith.constant 0 : index
    %c0_14 = arith.constant 0 : index
    %15 = vector.load %arg5[%c0_13, %c0_14] : memref<1x128xf32, #tpu.memory_space<vmem>>, vector<1x128xf32>
    %16 = vector.broadcast %15 : vector<1x128xf32> to vector<128x128xf32>
    %17 = arith.addf %14, %16 : vector<128x128xf32>
    %18 = arith.addf %10, %17 : vector<128x128xf32>
    %c0_15 = arith.constant 0 : index
    %c0_16 = arith.constant 0 : index
    %19 = vector.load %arg6[%c0_15, %c0_16] : memref<128x128xf32, #tpu.memory_space<vmem>>, vector<128x128xf32>
    %cst_17 = arith.constant dense<0.000000e+00> : vector<128x128xf32>
    %20 = tpu.matmul %18, %19, %cst_17 {dimension_numbers = #tpu.dot_dimension_numbers<[1], [0], [0], [1], [0, 0, 1, 1], [], []>} : vector<128x128xf32>, vector<128x128xf32>, vector<128x128xf32> -> vector<128x128xf32>
    %c0_18 = arith.constant 0 : index
    %c0_19 = arith.constant 0 : index
    %21 = vector.load %arg7[%c0_18, %c0_19] : memref<1x128xf32, #tpu.memory_space<vmem>>, vector<1x128xf32>
    %22 = vector.broadcast %21 : vector<1x128xf32> to vector<128x128xf32>
    %23 = arith.addf %20, %22 : vector<128x128xf32>
    %24 = tpu.iota {dimensions = array<i32: 1>} : vector<128x128xi32>
    %c4_i32 = arith.constant 4 : i32
    %25 = vector.broadcast %c4_i32 : i32 to vector<128x128xi32>
    %26 = arith.cmpi slt, %24, %25 : vector<128x128xi32>
    %cst_20 = arith.constant -1.000000e+30 : f32
    %27 = vector.broadcast %cst_20 : f32 to vector<128x128xf32>
    %28 = arith.select %26, %23, %27 : vector<128x128xi1>, vector<128x128xf32>
    %cst_21 = arith.constant dense<0xFF800000> : vector<128xf32>
    %29 = vector.multi_reduction <maximumf>, %28, %cst_21 [1] : vector<128x128xf32> to vector<128xf32>
    %30 = vector.shape_cast %29 : vector<128xf32> to vector<128x1xf32>
    %31 = vector.broadcast %30 : vector<128x1xf32> to vector<128x128xf32>
    %32 = arith.subf %28, %31 : vector<128x128xf32>
    %33 = math.exp %32 : vector<128x128xf32>
    %cst_22 = arith.constant 0.000000e+00 : f32
    %34 = vector.broadcast %cst_22 : f32 to vector<128x128xf32>
    %35 = arith.select %26, %33, %34 : vector<128x128xi1>, vector<128x128xf32>
    %cst_23 = arith.constant dense<0.000000e+00> : vector<128xf32>
    %36 = vector.multi_reduction <add>, %35, %cst_23 [1] : vector<128x128xf32> to vector<128xf32>
    %37 = vector.shape_cast %36 : vector<128xf32> to vector<128x1xf32>
    %38 = math.log %37 : vector<128x1xf32>
    %39 = arith.addf %38, %30 : vector<128x1xf32>
    %40 = vector.broadcast %39 : vector<128x1xf32> to vector<128x128xf32>
    %41 = arith.subf %28, %40 : vector<128x128xf32>
    %c0_24 = arith.constant 0 : index
    %c0_25 = arith.constant 0 : index
    %42 = vector.load %arg8[%c0_24, %c0_25] : memref<128x128xf32, #tpu.memory_space<vmem>>, vector<128x128xf32>
    tpu.vector_store %arg8[%c0_24, %c0_25], %41 {strides = array<i32>} : memref<128x128xf32, #tpu.memory_space<vmem>>, vector<128x128xf32>,
    return
  }
}

</mosaic_0001>

<bundles_post_ra>
// kernel: tpu_custom_call.1
= control target key start
LH: loop header
LB: loop body
LE: loop exit
PB: predicated region body
PF: predicated region fallthrough
CT: control target
= control target key end

     0   :  { %13 = vsyncpa [#allocation3], 0  ;;  %s1863_s0 = inlined_call_operand.hbm [shape: f32[128,128], index: 0, kind: input, shape index: {}]   ;;  %s1864_s1 = inlined_call_operand.hbm [shape: f32[128,128], index: 1, kind: input, shape index: {}]   ;;  %s1865_s2 = inlined_call_operand.hbm [shape: f32[256,128], index: 2, kind: input, shape index: {}]   ;;  %s1866_s3 = inlined_call_operand.vmem [shape: f32[1,128], index: 3, kind: input, shape index: {}]   ;;  %s1867_s4 = inlined_call_operand.hbm [shape: f32[256,128], index: 4, kind: input, shape index: {}]   ;;  %s1868_s5 = inlined_call_operand.vmem [shape: f32[1,128], index: 5, kind: input, shape index: {}]   ;;  %s1869_s6 = inlined_call_operand.hbm [shape: f32[128,128], index: 6, kind: input, shape index: {}]   ;;  %s1870_s7 = inlined_call_operand.vmem [shape: f32[1,128], index: 7, kind: input, shape index: {}]   ;;  %s1871_s8 = inlined_call_operand.hbm [shape: f32[128,128], index: 8, kind: output, shape index: {}]  }
   0x1   :  { %14 = vsyncpa [#allocation6], 0 }
   0x2   :  { %15 = vsyncpa [#allocation9], 0 }
   0x3   :  { %16 = vsyncpa [#allocation4], 0  ;;  %s34_s29 = sshll.u32 %s1864_s1, 4  ;;  %s1242_s30 = smov [#allocation5]   ;;  %s35_s29 = int_to_ptr.hbm [resolvable:$true] %s34_s29 }
   0x4   :  { %s36_s9 = sshll.u32 %s1242_s30, 4  ;;  %s62_s12 = sshll.u32 %s1867_s4, 4  ;;  %s37_s9 = int_to_ptr.vmem [resolvable:$true] %s36_s9  ;;  %s63_s12 = int_to_ptr.hbm [resolvable:$true] %s62_s12 }
   0x5   :  { %s1243_s13 = smov 128   ;;  %s1244_s14 = smov 8  }
   0x6   :  { %42 = dma.hbm_to_vmem [thread:$0]  %s35_s29, 2048, %s37_s9, [#allocation6], %s1243_s13, %s1243_s13, %s1244_s14  }
   0x7   :  { %s1245_s15 = smov [#allocation8]   ;;  %s21_s1 = sshll.u32 %s1863_s0, 4  ;;  %s22_s1 = int_to_ptr.hbm [resolvable:$true] %s21_s1 }
   0x8   :  { %s64_s16 = sshll.u32 %s1245_s15, 4  ;;  %s47_s20 = sshll.u32 %s1865_s2, 4  ;;  %s65_s16 = int_to_ptr.vmem [resolvable:$true] %s64_s16  ;;  %s48_s20 = int_to_ptr.hbm [resolvable:$true] %s47_s20 }
   0x9   :  { %70 = dma.hbm_to_vmem [thread:$0]  %s63_s12, 4096, %s65_s16, [#allocation9], %s1243_s13, %s1243_s13, %s1244_s14  }
   0xa   :  { %s1246_s21 = smov [#allocation2]   ;;  %s1247_s23 = smov [#allocation7]  }
   0xb   :  { %s23_s22 = sshll.u32 %s1246_s21, 4  ;;  %s49_s0 = sshll.u32 %s1247_s23, 4  ;;  %s24_s22 = int_to_ptr.vmem [resolvable:$true] %s23_s22  ;;  %s50_s0 = int_to_ptr.vmem [resolvable:$true] %s49_s0 }
   0xc   :  { %29 = dma.hbm_to_vmem [thread:$0]  %s22_s1, 2048, %s24_s22, [#allocation3], %s1243_s13, %s1243_s13, %s1244_s14  }
   0xd   :  { %s77_s26 = sshll.u32 %s1869_s6, 4  ;;  %s1248_s2 = smov [#allocation10]   ;;  %s78_s26 = int_to_ptr.hbm [resolvable:$true] %s77_s26 }
   0xe   :  { %55 = dma.hbm_to_vmem [thread:$0]  %s48_s20, 4096, %s50_s0, [#allocation6], %s1243_s13, %s1243_s13, %s1244_s14  }
   0xf   :  { %s79_s27 = sshll.u32 %s1248_s2, 4  ;;  %s80_s27 = int_to_ptr.vmem [resolvable:$true] %s79_s27 }
  0x10   :  { %85 = dma.hbm_to_vmem [thread:$0]  %s78_s26, 2048, %s80_s27, [#allocation9], %s1243_s13, %s1243_s13, %s1244_s14  }
  0x11   :  { %1234 = dma.done.wait [#allocation3], 2048  }
  0x12   :  { %1235 = vsyncadd [#allocation3], 4294965248 }
  0x13   :  { %1236 = dma.done.wait [#allocation6], 6144  }
  0x14   :  { %1237 = vsyncadd [#allocation6], 4294961152 }
  0x15   :  { %1238 = dma.done.wait [#allocation9], 6144  }
  0x16   :  { %1239 = vsyncadd [#allocation9], 4294961152  ;;  %v1325_v0 = vld [vmem:[#allocation2 + $0x78] sm:$0xff]  ;;  %v1327_v1 = vld [vmem:[#allocation2 + $0x70] sm:$0xff]  ;;  %s952_s12 = sshll.u32 %s1871_s8, 4  ;;  %s953_s12 = int_to_ptr.hbm [resolvable:$true] %s952_s12 }
  0x17   :  { %140 = vmatpush.msra.mxu0 %v1325_v0  ;;  %967 = vmatpush.msra.mxu3 %v1325_v0  ;;  %v1331_v2 = vld [vmem:[#allocation2 + $0x68] sm:$0xff]  ;;  %v1335_v3 = vld [vmem:[#allocation2 + $0x60] sm:$0xff]  ;;  %v1339_v4 = vld [vmem:[#allocation2 + $0x58] sm:$0xff] }
  0x18   :  { %v1343_v5 = vld [vmem:[#allocation2 + $0x50] sm:$0xff]  ;;  %v1347_v6 = vld [vmem:[#allocation2 + $0x48] sm:$0xff]  ;;  %v1351_v7 = vld [vmem:[#allocation2 + $0x40] sm:$0xff] }
  0x19   :  { %141 = vmatpush.msra.mxu0 %v1327_v1  ;;  %968 = vmatpush.msra.mxu3 %v1327_v1  ;;  %v1355_v8 = vld [vmem:[#allocation2 + $0x38] sm:$0xff]  ;;  %v1359_v9 = vld [vmem:[#allocation2 + $0x30] sm:$0xff]  ;;  %v1363_v10 = vld [vmem:[#allocation2 + $0x28] sm:$0xff] }
  0x1a   :  { %v1367_v11 = vld [vmem:[#allocation2 + $0x20] sm:$0xff]  ;;  %v1371_v12 = vld [vmem:[#allocation2 + $0x18] sm:$0xff]  ;;  %v1375_v13 = vld [vmem:[#allocation2 + $0x10] sm:$0xff] }
  0x1b   :  { %142 = vmatpush.msra.mxu0 %v1331_v2  ;;  %969 = vmatpush.msra.mxu3 %v1331_v2  ;;  %v1379_v14 = vld [vmem:[#allocation2 + $0x8] sm:$0xff]  ;;  %v1383_v15 = vld [vmem:[#allocation2] sm:$0xff]  ;;  %v1401_v20 = vld [vmem:[#allocation5 + $0x10] sm:$0xff] }
  0x1c   :  { %v1387_v16 = vld [vmem:[#allocation5] sm:$0xff]  ;;  %v1395_v18 = vld [vmem:[#allocation5 + $0x8] sm:$0xff]  ;;  %v1403_v21 = vld [vmem:[#allocation5 + $0x30] sm:$0xff] }
  0x1d   :  { %143 = vmatpush.msra.mxu0 %v1335_v3  ;;  %970 = vmatpush.msra.mxu3 %v1335_v3  ;;  %v1389_v17 = vld [vmem:[#allocation5 + $0x20] sm:$0xff]  ;;  %v1397_v19 = vld [vmem:[#allocation5 + $0x28] sm:$0xff]  ;;  %v1407_v22 = vld [vmem:[#allocation5 + $0x18] sm:$0xff] }
  0x1e   :  { %v1409_v23 = vld [vmem:[#allocation5 + $0x38] sm:$0xff]  ;;  %v1413_v24 = vld [vmem:[#allocation5 + $0x40] sm:$0xff]  ;;  %v1416_v25 = vld [vmem:[#allocation5 + $0x48] sm:$0xff] }
  0x1f   :  { %144 = vmatpush.msra.mxu0 %v1339_v4  ;;  %971 = vmatpush.msra.mxu3 %v1339_v4  ;;  %v1419_v26 = vld [vmem:[#allocation5 + $0x50] sm:$0xff]  ;;  %v1422_v27 = vld [vmem:[#allocation5 + $0x58] sm:$0xff]  ;;  %v218_v32 = vld [vmem:[#allocation7 + $0x68] sm:$0xff] }
  0x20   :  { %v220_v28 = vld [vmem:[#allocation7 + $0x78] sm:$0xff]  ;;  %v219_v29 = vld [vmem:[#allocation7 + $0x70] sm:$0xff]  ;;  %v1430_v33 = vld [vmem:[#allocation7 + $0xe8] sm:$0xff] }
  0x21   :  { %145 = vmatpush.msra.mxu0 %v1343_v5  ;;  %972 = vmatpush.msra.mxu3 %v1343_v5  ;;  %v1425_v30 = vld [vmem:[#allocation7 + $0xf8] sm:$0xff]  ;;  %v1428_v31 = vld [vmem:[#allocation7 + $0xf0] sm:$0xff]  ;;  %v217_v34 = vld [vmem:[#allocation7 + $0x60] sm:$0xff] }
  0x22   :  { %999 = vmatpush.msra.mxu2 %v1425_v30  ;;  %983 = vmatpush.msra.mxu1 %v220_v28  ;;  %v1433_v35 = vld [vmem:[#allocation7 + $0xe0] sm:$0xff]  ;;  %v216_v37 = vld [vmem:[#allocation7 + $0x58] sm:$0xff]  ;;  %v215_v39 = vld [vmem:[#allocation7 + $0x50] sm:$0xff] }
  0x23   :  { %146 = vmatpush.msra.mxu0 %v1347_v6  ;;  %973 = vmatpush.msra.mxu3 %v1347_v6  ;;  %v1435_v36 = vld [vmem:[#allocation5 + $0x60] sm:$0xff]  ;;  %v1438_v38 = vld [vmem:[#allocation7 + $0xd8] sm:$0xff]  ;;  %v1442_v40 = vld [vmem:[#allocation7 + $0xd0] sm:$0xff] }
  0x24   :  { %1000 = vmatpush.msra.mxu2 %v1428_v31  ;;  %984 = vmatpush.msra.mxu1 %v219_v29  ;;  %v214_v41 = vld [vmem:[#allocation7 + $0x48] sm:$0xff]  ;;  %v213_v43 = vld [vmem:[#allocation7 + $0x40] sm:$0xff]  ;;  %v212_v46 = vld [vmem:[#allocation7 + $0x38] sm:$0xff] }
  0x25   :  { %147 = vmatpush.msra.mxu0 %v1351_v7  ;;  %974 = vmatpush.msra.mxu3 %v1351_v7  ;;  %v1445_v42 = vld [vmem:[#allocation7 + $0xc8] sm:$0xff]  ;;  %v229_v44 = vld [vmem:[#allocation7 + $0xc0] sm:$0xff]  ;;  %v228_v47 = vld [vmem:[#allocation7 + $0xb8] sm:$0xff] }
  0x26   :  { %1001 = vmatpush.msra.mxu2 %v1430_v33  ;;  %985 = vmatpush.msra.mxu1 %v218_v32  ;;  %v1448_v45 = vld [vmem:[#allocation5 + $0x68] sm:$0xff]  ;;  %v211_v48 = vld [vmem:[#allocation7 + $0x30] sm:$0xff]  ;;  %v209_v52 = vld [vmem:[#allocation7 + $0x20] sm:$0xff] }
  0x27   :  { %148 = vmatpush.msra.mxu0 %v1355_v8  ;;  %975 = vmatpush.msra.mxu3 %v1355_v8  ;;  %v227_v49 = vld [vmem:[#allocation7 + $0xb0] sm:$0xff]  ;;  %v210_v50 = vld [vmem:[#allocation7 + $0x28] sm:$0xff]  ;;  %v225_v53 = vld [vmem:[#allocation7 + $0xa0] sm:$0xff] }
  0x28   :  { %1002 = vmatpush.msra.mxu2 %v1433_v35  ;;  %986 = vmatpush.msra.mxu1 %v217_v34  ;;  %v226_v51 = vld [vmem:[#allocation7 + $0xa8] sm:$0xff]  ;;  %v1452_v54 = vld [vmem:[#allocation5 + $0x70] sm:$0xff]  ;;  %v208_v55 = vld [vmem:[#allocation7 + $0x18] sm:$0xff] }
  0x29   :  { %149 = vmatpush.msra.mxu0 %v1359_v9  ;;  %976 = vmatpush.msra.mxu3 %v1359_v9  ;;  %v224_v56 = vld [vmem:[#allocation7 + $0x98] sm:$0xff]  ;;  %v207_v57 = vld [vmem:[#allocation7 + $0x10] sm:$0xff]  ;;  %v206_v59 = vld [vmem:[#allocation7 + $0x8] sm:$0xff] }
  0x2a   :  { %1003 = vmatpush.msra.mxu2 %v1438_v38  ;;  %987 = vmatpush.msra.mxu1 %v216_v37  ;;  %v223_v58 = vld [vmem:[#allocation7 + $0x90] sm:$0xff]  ;;  %v1455_v60 = vld [vmem:[#allocation5 + $0x78] sm:$0xff]  ;;  %v205_v61 = vld [vmem:[#allocation7] sm:$0xff] }
  0x2b   :  { %150 = vmatpush.msra.mxu0 %v1363_v10  ;;  %977 = vmatpush.msra.mxu3 %v1363_v10  ;;  %v222_v62 = vld [vmem:[#allocation7 + $0x88] sm:$0xff]  ;;  %v221_v63 = vld [vmem:[#allocation7 + $0x80] sm:$0xff] }
  0x2c   :  { %1004 = vmatpush.msra.mxu2 %v1442_v40  ;;  %988 = vmatpush.msra.mxu1 %v215_v39 }
  0x2d   :  { %151 = vmatpush.msra.mxu0 %v1367_v11  ;;  %978 = vmatpush.msra.mxu3 %v1367_v11 }
  0x2e   :  { %1005 = vmatpush.msra.mxu2 %v1445_v42  ;;  %989 = vmatpush.msra.mxu1 %v214_v41 }
  0x2f   :  { %152 = vmatpush.msra.mxu0 %v1371_v12  ;;  %979 = vmatpush.msra.mxu3 %v1371_v12 }
  0x30   :  { %1006 = vmatpush.msra.mxu2 %v229_v44  ;;  %990 = vmatpush.msra.mxu1 %v213_v43 }
  0x31   :  { %153 = vmatpush.msra.mxu0 %v1375_v13  ;;  %980 = vmatpush.msra.mxu3 %v1375_v13 }
  0x32   :  { %1007 = vmatpush.msra.mxu2 %v228_v47  ;;  %991 = vmatpush.msra.mxu1 %v212_v46 }
  0x33   :  { %154 = vmatpush.msra.mxu0 %v1379_v14  ;;  %981 = vmatpush.msra.mxu3 %v1379_v14 }
  0x34   :  { %1008 = vmatpush.msra.mxu2 %v227_v49  ;;  %992 = vmatpush.msra.mxu1 %v211_v48 }
  0x35   :  { %155 = vmatpush.msra.mxu0 %v1383_v15  ;;  %982 = vmatpush.msra.mxu3 %v1383_v15 }
  0x36   :  { %156 = vmatmul.f32.vlgmr.msra.gmra.mxu0 %v1387_v16  ;;  %168 = vmatmul.f32.vlgmr.msra.gmra.mxu3 %v1389_v17 }
  0x37   :  { %241 = vmatpush.msrb.mxu0 %v220_v28  ;;  %1009 = vmatpush.msra.mxu2 %v226_v51 }
  0x38   :  { %993 = vmatpush.msra.mxu1 %v210_v50 }
  0x39   :  { %242 = vmatpush.msrb.mxu0 %v219_v29  ;;  %1010 = vmatpush.msra.mxu2 %v225_v53 }
  0x3a   :  { %994 = vmatpush.msra.mxu1 %v209_v52 }
  0x3b   :  { %243 = vmatpush.msrb.mxu0 %v218_v32  ;;  %1011 = vmatpush.msra.mxu2 %v224_v56  ;;  %v483_v32 = vld [vmem:[#allocation8 + $0xf8] sm:$0xff] }
  0x3c   :  { %995 = vmatpush.msra.mxu1 %v208_v55 }
  0x3d   :  { %244 = vmatpush.msrb.mxu0 %v217_v34  ;;  %1012 = vmatpush.msra.mxu2 %v223_v58 }
  0x3e   :  { %159 = vmatmul.f32.gmra.mxu0 %v1395_v18  ;;  %171 = vmatmul.f32.gmra.mxu3 %v1397_v19 }
  0x3f   :  { %245 = vmatpush.msrb.mxu0 %v216_v37  ;;  %996 = vmatpush.msra.mxu1 %v207_v57  ;;  %v476_v37 = vld [vmem:[#allocation8 + $0xc0] sm:$0xff] }
  0x40   :  { %1013 = vmatpush.msra.mxu2 %v222_v62 }
  0x41   :  { %246 = vmatpush.msrb.mxu0 %v215_v39  ;;  %997 = vmatpush.msra.mxu1 %v206_v59  ;;  %v474_v39 = vld [vmem:[#allocation8 + $0xb0] sm:$0xff] }
  0x42   :  { %1014 = vmatpush.msra.mxu2 %v221_v63 }
  0x43   :  { %247 = vmatpush.msrb.mxu0 %v214_v41  ;;  %998 = vmatpush.msra.mxu1 %v205_v61 }
  0x44   :  { %334 = vmatmul.f32.vlgmr.msra.gmra.mxu2 %v1367_v11 }
  0x45   :  { %248 = vmatpush.msrb.mxu0 %v213_v43  ;;  %553 = vmatpush.msrb.mxu1 %v483_v32  ;;  %v471_v43 = vld [vmem:[#allocation8 + $0x98] sm:$0xff] }
  0x46   :  { %162 = vmatmul.f32.gmra.mxu0 %v1401_v20  ;;  %174 = vmatmul.f32.gmra.mxu3 %v1403_v21 }
  0x47   :  { %249 = vmatpush.msrb.mxu0 %v212_v46 }
  0x49   :  { %250 = vmatpush.msrb.mxu0 %v211_v48  ;;  %v468_v48 = vld [vmem:[#allocation8 + $0x80] sm:$0xff] }
  0x4b   :  { %251 = vmatpush.msrb.mxu0 %v210_v50 }
  0x4c   :  { %337 = vmatmul.f32.gmra.mxu2 %v1363_v10 }
  0x4d   :  { %252 = vmatpush.msrb.mxu0 %v209_v52 }
  0x4e   :  { %165 = vmatmul.f32.gmra.mxu0 %v1407_v22  ;;  %177 = vmatmul.f32.gmra.mxu3 %v1409_v23 }
  0x4f   :  { %253 = vmatpush.msrb.mxu0 %v208_v55 }
  0x51   :  { %254 = vmatpush.msrb.mxu0 %v207_v57 }
  0x53   :  { %255 = vmatpush.msrb.mxu0 %v206_v59  ;;  %v1486_v59 = vld [vmem:[%s1866_s3] ss:$0 sm:$0xff] }
  0x54   :  { %340 = vmatmul.f32.gmra.mxu2 %v1359_v9 }
  0x55   :  { %256 = vmatpush.msrb.mxu0 %v205_v61 }
  0x56   :  { %180 = vmatmul.f32.gmra.mxu3 %v1413_v24 }
  0x57   :  { %306 = vmatpush.msra.mxu0 %v1425_v30 }
  0x59   :  { %307 = vmatpush.msra.mxu0 %v1428_v31 }
  0x5b   :  { %308 = vmatpush.msra.mxu0 %v1430_v33  ;;  %v480_v33 = vld [vmem:[#allocation8 + $0xe0] sm:$0xff] }
  0x5c   :  { %343 = vmatmul.f32.gmra.mxu2 %v1355_v8 }
  0x5d   :  { %309 = vmatpush.msra.mxu0 %v1433_v35  ;;  %v477_v35 = vld [vmem:[#allocation8 + $0xc8] sm:$0xff] }
  0x5e   :  { %183 = vmatmul.f32.gmra.mxu3 %v1416_v25 }
  0x5f   :  { %310 = vmatpush.msra.mxu0 %v1438_v38  ;;  %v475_v38 = vld [vmem:[#allocation8 + $0xb8] sm:$0xff] }
  0x61   :  { %311 = vmatpush.msra.mxu0 %v1442_v40  ;;  %v473_v40 = vld [vmem:[#allocation8 + $0xa8] sm:$0xff] }
  0x63   :  { %312 = vmatpush.msra.mxu0 %v1445_v42  ;;  %v472_v42 = vld [vmem:[#allocation8 + $0xa0] sm:$0xff] }
  0x64   :  { %346 = vmatmul.f32.gmra.mxu2 %v1351_v7 }
  0x65   :  { %313 = vmatpush.msra.mxu0 %v229_v44  ;;  %v470_v44 = vld [vmem:[#allocation8 + $0x90] sm:$0xff] }
  0x66   :  { %186 = vmatmul.f32.gmra.mxu3 %v1419_v26 }
  0x67   :  { %314 = vmatpush.msra.mxu0 %v228_v47  ;;  %v469_v47 = vld [vmem:[#allocation8 + $0x88] sm:$0xff] }
  0x69   :  { %315 = vmatpush.msra.mxu0 %v227_v49 }
  0x6b   :  { %316 = vmatpush.msra.mxu0 %v226_v51 }
  0x6c   :  { %349 = vmatmul.f32.gmra.mxu2 %v1347_v6 }
  0x6d   :  { %317 = vmatpush.msra.mxu0 %v225_v53 }
  0x6e   :  { %189 = vmatmul.f32.gmra.mxu3 %v1422_v27 }
  0x6f   :  { %318 = vmatpush.msra.mxu0 %v224_v56 }
  0x71   :  { %319 = vmatpush.msra.mxu0 %v223_v58 }
  0x73   :  { %320 = vmatpush.msra.mxu0 %v222_v62 }
  0x74   :  { %352 = vmatmul.f32.gmra.mxu2 %v1343_v5 }
  0x75   :  { %321 = vmatpush.msra.mxu0 %v221_v63 }
  0x76   :  { %192 = vmatmul.f32.gmra.mxu3 %v1435_v36 }
  0x7c   :  { %355 = vmatmul.f32.gmra.mxu2 %v1339_v4 }
  0x7e   :  { %195 = vmatmul.f32.gmra.mxu3 %v1448_v45 }
  0x84   :  { %358 = vmatmul.f32.gmra.mxu2 %v1335_v3 }
  0x86   :  { %198 = vmatmul.f32.gmra.mxu3 %v1452_v54 }
  0x8c   :  { %361 = vmatmul.f32.gmra.mxu2 %v1331_v2 }
  0x8e   :  { %201 = vmatmul.f32.gmra.mxu3 %v1455_v60 }
  0x94   :  { %364 = vmatmul.f32.gmra.mxu2 %v1327_v1  ;;  %v481_v1 = vld [vmem:[#allocation8 + $0xe8] sm:$0xff] }
  0x9c   :  { %367 = vmatmul.f32.gmra.mxu2 %v1325_v0  ;;  %v478_v0 = vld [vmem:[#allocation8 + $0xd0] sm:$0xff] }
  0xb3   :  { %v157_v11 = vpop.f32.mrf.mxu0 }
  0xb4   :  { %257 = vmatmul.f32.vlgmr.msrb.gmra.mxu0 %v157_v11 }
  0xb9   :  { %v169_v10 = vpop.f32.mrf.mxu3 }
  0xba   :  { %269 = vmatmul.f32.vlgmr.msra.gmra.mxu1 %v169_v10 }
  0xbb   :  { %v160_v28 = vpop.f32.mrf.mxu0 }
  0xbc   :  { %260 = vmatmul.f32.gmra.mxu0 %v160_v28 }
  0xc1   :  { %v172_v9 = vpop.f32.mrf.mxu3 }
  0xc2   :  { %272 = vmatmul.f32.gmra.mxu1 %v172_v9 }
  0xc3   :  { %v163_v29 = vpop.f32.mrf.mxu0 }
  0xc4   :  { %263 = vmatmul.f32.gmra.mxu0 %v163_v29 }
  0xc7   :  { %v1481_v34 = vpop.f32.mrf.mxu2 }
  0xc9   :  { %v175_v8 = vpop.f32.mrf.mxu3 }
  0xca   :  { %275 = vmatmul.f32.gmra.mxu1 %v175_v8 }
  0xcb   :  { %v166_v30 = vpop.f32.mrf.mxu0 }
  0xcc   :  { %266 = vmatmul.f32.gmra.mxu0 %v166_v30 }
  0xcf   :  { %v338_v41 = vpop.f32.mrf.mxu2 }
  0xd1   :  { %v178_v31 = vpop.f32.mrf.mxu3 }
  0xd2   :  { %278 = vmatmul.f32.gmra.mxu1 %v178_v31 }
  0xd4   :  { %322 = vmatmul.f32.vlgmr.msra.gmra.mxu0 %v1383_v15 }
  0xd7   :  { %v341_v49 = vpop.f32.mrf.mxu2 }
  0xd9   :  { %v181_v7 = vpop.f32.mrf.mxu3 }
  0xda   :  { %281 = vmatmul.f32.gmra.mxu1 %v181_v7 }
  0xdc   :  { %325 = vmatmul.f32.gmra.mxu0 %v1379_v14 }
  0xdf   :  { %v344_v53 = vpop.f32.mrf.mxu2 }
  0xe1   :  { %v184_v6 = vpop.f32.mrf.mxu3 }
  0xe2   :  { %284 = vmatmul.f32.gmra.mxu1 %v184_v6 }
  0xe4   :  { %328 = vmatmul.f32.gmra.mxu0 %v1375_v13  ;;  %v482_v13 = vld [vmem:[#allocation8 + $0xf0] sm:$0xff] }
  0xe5   :  { %554 = vmatpush.msrb.mxu1 %v482_v13 }
  0xe7   :  { %555 = vmatpush.msrb.mxu1 %v481_v1  ;;  %v347_v58 = vpop.f32.mrf.mxu2 }
  0xe9   :  { %v187_v5 = vpop.f32.mrf.mxu3  ;;  %556 = vmatpush.msrb.mxu1 %v480_v33 }
  0xea   :  { %287 = vmatmul.f32.gmra.mxu1 %v187_v5 }
  0xec   :  { %331 = vmatmul.f32.gmra.mxu0 %v1371_v12  ;;  %v479_v12 = vld [vmem:[#allocation8 + $0xd8] sm:$0xff] }
  0xed   :  { %557 = vmatpush.msrb.mxu1 %v479_v12 }
  0xef   :  { %558 = vmatpush.msrb.mxu1 %v478_v0  ;;  %v1489_v10 = vpop.f32.mrf.mxu2 }
  0xf1   :  { %v190_v4 = vpop.f32.mrf.mxu3  ;;  %559 = vmatpush.msrb.mxu1 %v477_v35 }
  0xf2   :  { %290 = vmatmul.f32.gmra.mxu1 %v190_v4 }
  0xf3   :  { %560 = vmatpush.msrb.mxu1 %v476_v37 }
  0xf5   :  { %561 = vmatpush.msrb.mxu1 %v475_v38 }
  0xf7   :  { %562 = vmatpush.msrb.mxu1 %v474_v39  ;;  %v353_v7 = vpop.f32.mrf.mxu2 }
  0xf9   :  { %v193_v3 = vpop.f32.mrf.mxu3  ;;  %563 = vmatpush.msrb.mxu1 %v473_v40 }
  0xfa   :  { %293 = vmatmul.f32.gmra.mxu1 %v193_v3 }
  0xfb   :  { %564 = vmatpush.msrb.mxu1 %v472_v42 }
  0xfd   :  { %565 = vmatpush.msrb.mxu1 %v471_v43 }
  0xff   :  { %566 = vmatpush.msrb.mxu1 %v470_v44  ;;  %v356_v32 = vpop.f32.mrf.mxu2 }
 0x101   :  { %v196_v15 = vpop.f32.mrf.mxu3  ;;  %567 = vmatpush.msrb.mxu1 %v469_v47 }
 0x102   :  { %296 = vmatmul.f32.gmra.mxu1 %v196_v15 }
 0x103   :  { %568 = vmatpush.msrb.mxu1 %v468_v48 }
 0x107   :  { %v359_v37 = vpop.f32.mrf.mxu2 }
 0x109   :  { %v199_v14 = vpop.f32.mrf.mxu3 }
 0x10a   :  { %299 = vmatmul.f32.gmra.mxu1 %v199_v14 }
 0x10f   :  { %v362_v43 = vpop.f32.mrf.mxu2 }
 0x111   :  { %v202_v2 = vpop.f32.mrf.mxu3 }
 0x112   :  { %302 = vmatmul.f32.gmra.mxu1 %v202_v2 }
 0x131   :  { %v258_v46 = vpop.f32.mrf.mxu0 }
 0x132   :  { %v259_v61 = vadd.f32 %v1486_v59, %v258_v46 }
 0x137   :  { %v270_v50 = vpop.f32.mrf.mxu1 }
 0x138   :  { %v271_v33 = vadd.f32 %v1486_v59, %v270_v50 }
 0x139   :  { %v261_v51 = vpop.f32.mrf.mxu0 }
 0x13a   :  { %v262_v9 = vadd.f32 %v1486_v59, %v261_v51  ;;  %v336_v35 = vadd.f32 %v1481_v34, %v271_v33  ;;  %v365_v51 = vpop.f32.mrf.mxu2 }
 0x13c   :  { %v1508_v38 = vmax.f32 %v336_v35, 0.0 }
 0x13f   :  { %v273_v52 = vpop.f32.mrf.mxu1 }
 0x140   :  { %v274_v39 = vadd.f32 %v1486_v59, %v273_v52 }
 0x141   :  { %v264_v55 = vpop.f32.mrf.mxu0 }
 0x142   :  { %v265_v6 = vadd.f32 %v1486_v59, %v264_v55  ;;  %v339_v42 = vadd.f32 %v338_v41, %v274_v39  ;;  %v454_v39 = vld [vmem:[#allocation8 + $0x10] sm:$0xff] }
 0x144   :  { %v1512_v44 = vmax.f32 %v339_v42, 0.0 }
 0x147   :  { %v276_v56 = vpop.f32.mrf.mxu1 }
 0x148   :  { %v277_v46 = vadd.f32 %v1486_v59, %v276_v56 }
 0x149   :  { %v267_v57 = vpop.f32.mrf.mxu0 }
 0x14a   :  { %v268_v14 = vadd.f32 %v1486_v59, %v267_v57  ;;  %v342_v48 = vadd.f32 %v341_v49, %v277_v46  ;;  %v368_v49 = vpop.f32.mrf.mxu2 }
 0x14c   :  { %v1516_v50 = vmax.f32 %v342_v48, 0.0 }
 0x14f   :  { %v279_v62 = vpop.f32.mrf.mxu1 }
 0x150   :  { %v280_v34 = vadd.f32 %v1486_v59, %v279_v62 }
 0x151   :  { %v323_v63 = vpop.f32.mrf.mxu0 }
 0x152   :  { %v324_v11 = vadd.f32 %v323_v63, %v259_v61  ;;  %v345_v55 = vadd.f32 %v344_v53, %v280_v34 }
 0x154   :  { %v1491_v28 = vmax.f32 %v324_v11, 0.0  ;;  %v1521_v57 = vmax.f32 %v345_v55, 0.0  ;;  %v646_v55 = vld [vmem:[#allocation10 + $0x60] sm:$0xff] }
 0x156   :  { %569 = vmatmul.f32.vlgmr.msrb.gmra.mxu1 %v1491_v28 }
 0x157   :  { %v282_v29 = vpop.f32.mrf.mxu1 }
 0x158   :  { %v283_v41 = vadd.f32 %v1486_v59, %v282_v29 }
 0x159   :  { %v326_v8 = vpop.f32.mrf.mxu0 }
 0x15a   :  { %v327_v30 = vadd.f32 %v326_v8, %v262_v9  ;;  %v348_v56 = vadd.f32 %v347_v58, %v283_v41  ;;  %v645_v41 = vld [vmem:[#allocation10 + $0x58] sm:$0xff] }
 0x15c   :  { %v1495_v31 = vmax.f32 %v327_v30, 0.0  ;;  %v1528_v53 = vmax.f32 %v348_v56, 0.0 }
 0x15e   :  { %572 = vmatmul.f32.gmra.mxu1 %v1495_v31 }
 0x15f   :  { %v285_v5 = vpop.f32.mrf.mxu1 }
 0x160   :  { %v286_v29 = vadd.f32 %v1486_v59, %v285_v5 }
 0x161   :  { %v329_v4 = vpop.f32.mrf.mxu0 }
 0x162   :  { %v330_v3 = vadd.f32 %v329_v4, %v265_v6 }
 0x164   :  { %v1499_v15 = vmax.f32 %v330_v3, 0.0 }
 0x166   :  { %575 = vmatmul.f32.gmra.mxu1 %v1499_v15 }
 0x167   :  { %v288_v2 = vpop.f32.mrf.mxu1 }
 0x168   :  { %v289_v58 = vadd.f32 %v1486_v59, %v288_v2 }
 0x169   :  { %v332_v13 = vpop.f32.mrf.mxu0 }
 0x16a   :  { %v333_v1 = vadd.f32 %v332_v13, %v268_v14  ;;  %v354_v5 = vadd.f32 %v353_v7, %v289_v58  ;;  %v456_v7 = vld [vmem:[#allocation8 + $0x20] sm:$0xff]  ;;  %v635_v58 = vld [vmem:[#allocation10 + $0x8] sm:$0xff] }
 0x16c   :  { %v1504_v12 = vmax.f32 %v333_v1, 0.0  ;;  %v351_v1 = vadd.f32 %v1489_v10, %v286_v29  ;;  %v463_v10 = vld [vmem:[#allocation8 + $0x58] sm:$0xff] }
 0x16d   :  { %v637_v29 = vld [vmem:[#allocation10 + $0x18] sm:$0xff] }
 0x16e   :  { %578 = vmatmul.f32.gmra.mxu1 %v1504_v12 }
 0x16f   :  { %v291_v0 = vpop.f32.mrf.mxu1 }
 0x170   :  { %v292_v6 = vadd.f32 %v1486_v59, %v291_v0 }
 0x172   :  { %v357_v33 = vadd.f32 %v356_v32, %v292_v6  ;;  %v455_v32 = vld [vmem:[#allocation8 + $0x18] sm:$0xff]  ;;  %v636_v6 = vld [vmem:[#allocation10 + $0x10] sm:$0xff] }
 0x174   :  { %v1548_v2 = vmax.f32 %v357_v33, 0.0 }
 0x176   :  { %581 = vmatmul.f32.gmra.mxu1 %v1508_v38 }
 0x177   :  { %v294_v40 = vpop.f32.mrf.mxu1 }
 0x178   :  { %v295_v9 = vadd.f32 %v1486_v59, %v294_v40  ;;  %v453_v40 = vld [vmem:[#allocation8 + $0x8] sm:$0xff] }
 0x17a   :  { %v360_v14 = vadd.f32 %v359_v37, %v295_v9  ;;  %v1551_v37 = vmax.f32 %v354_v5, 0.0 }
 0x17c   :  { %v1543_v0 = vmax.f32 %v360_v14, 0.0  ;;  %v634_v14 = vld [vmem:[#allocation10] sm:$0xff] }
 0x17e   :  { %584 = vmatmul.f32.gmra.mxu1 %v1512_v44 }
 0x17f   :  { %v297_v47 = vpop.f32.mrf.mxu1 }
 0x180   :  { %v298_v11 = vadd.f32 %v1486_v59, %v297_v47 }
 0x182   :  { %v363_v4 = vadd.f32 %v362_v43, %v298_v11  ;;  %v641_v11 = vld [vmem:[#allocation10 + $0x38] sm:$0xff] }
 0x184   :  { %v1540_v35 = vmax.f32 %v363_v4, 0.0 }
 0x186   :  { %587 = vmatmul.f32.gmra.mxu1 %v1516_v50 }
 0x187   :  { %v300_v52 = vpop.f32.mrf.mxu1 }
 0x188   :  { %v301_v61 = vadd.f32 %v1486_v59, %v300_v52  ;;  %v647_v52 = vld [vmem:[#allocation10 + $0x68] sm:$0xff] }
 0x18a   :  { %v366_v8 = vadd.f32 %v365_v51, %v301_v61  ;;  %v644_v61 = vld [vmem:[#allocation10 + $0x50] sm:$0xff] }
 0x18c   :  { %v1535_v13 = vmax.f32 %v366_v8, 0.0  ;;  %v639_v8 = vld [vmem:[#allocation10 + $0x28] sm:$0xff] }
 0x18e   :  { %590 = vmatmul.f32.gmra.mxu1 %v1521_v57 }
 0x18f   :  { %v303_v63 = vpop.f32.mrf.mxu1 }
 0x190   :  { %v304_v62 = vadd.f32 %v1486_v59, %v303_v63  ;;  %v1546_v59 = vmax.f32 %v351_v1, 0.0  ;;  %v643_v63 = vld [vmem:[#allocation10 + $0x48] sm:$0xff] }
 0x192   :  { %v369_v30 = vadd.f32 %v368_v49, %v304_v62  ;;  %v642_v49 = vld [vmem:[#allocation10 + $0x40] sm:$0xff]  ;;  %v640_v62 = vld [vmem:[#allocation10 + $0x30] sm:$0xff] }
 0x194   :  { %v1532_v3 = vmax.f32 %v369_v30, 0.0  ;;  %v638_v30 = vld [vmem:[#allocation10 + $0x20] sm:$0xff] }
 0x196   :  { %387 = vmatpush.msrb.mxu3 %v1532_v3  ;;  %593 = vmatmul.f32.gmra.mxu1 %v1528_v53 }
 0x198   :  { %388 = vmatpush.msrb.mxu3 %v1535_v13 }
 0x19a   :  { %389 = vmatpush.msrb.mxu3 %v1540_v35 }
 0x19c   :  { %390 = vmatpush.msrb.mxu3 %v1543_v0 }
 0x19e   :  { %391 = vmatpush.msrb.mxu3 %v1548_v2  ;;  %596 = vmatmul.f32.gmra.mxu1 %v1546_v59 }
 0x1a0   :  { %392 = vmatpush.msrb.mxu3 %v1551_v37 }
 0x1a2   :  { %393 = vmatpush.msrb.mxu3 %v1546_v59 }
 0x1a4   :  { %394 = vmatpush.msrb.mxu3 %v1528_v53 }
 0x1a6   :  { %395 = vmatpush.msrb.mxu3 %v1521_v57  ;;  %599 = vmatmul.f32.gmra.mxu1 %v1551_v37 }
 0x1a8   :  { %396 = vmatpush.msrb.mxu3 %v1516_v50 }
 0x1aa   :  { %397 = vmatpush.msrb.mxu3 %v1512_v44 }
 0x1ac   :  { %398 = vmatpush.msrb.mxu3 %v1508_v38 }
 0x1ae   :  { %399 = vmatpush.msrb.mxu3 %v1504_v12  ;;  %602 = vmatmul.f32.gmra.mxu1 %v1548_v2 }
 0x1b0   :  { %400 = vmatpush.msrb.mxu3 %v1499_v15 }
 0x1b2   :  { %401 = vmatpush.msrb.mxu3 %v1495_v31 }
 0x1b4   :  { %402 = vmatpush.msrb.mxu3 %v1491_v28 }
 0x1b5   :  { %403 = vmatmul.f32.vlgmr.msrb.gmra.mxu3 %v1387_v16  ;;  %v467_v16 = vld [vmem:[#allocation8 + $0x78] sm:$0xff] }
 0x1b6   :  { %605 = vmatmul.f32.gmra.mxu1 %v1543_v0  ;;  %488 = vmatpush.msrb.mxu0 %v467_v16 }
 0x1bd   :  { %406 = vmatmul.f32.gmra.mxu3 %v1395_v18  ;;  %v466_v18 = vld [vmem:[#allocation8 + $0x70] sm:$0xff] }
 0x1be   :  { %608 = vmatmul.f32.gmra.mxu1 %v1540_v35  ;;  %489 = vmatpush.msrb.mxu0 %v466_v18 }
 0x1c5   :  { %409 = vmatmul.f32.gmra.mxu3 %v1401_v20  ;;  %v465_v20 = vld [vmem:[#allocation8 + $0x68] sm:$0xff] }
 0x1c6   :  { %611 = vmatmul.f32.gmra.mxu1 %v1535_v13  ;;  %490 = vmatpush.msrb.mxu0 %v465_v20 }
 0x1cd   :  { %412 = vmatmul.f32.gmra.mxu3 %v1407_v22  ;;  %v464_v22 = vld [vmem:[#allocation8 + $0x60] sm:$0xff] }
 0x1ce   :  { %614 = vmatmul.f32.gmra.mxu1 %v1532_v3  ;;  %491 = vmatpush.msrb.mxu0 %v464_v22  ;;  %v1591_v22 = vld [vmem:[%s1868_s5] ss:$0 sm:$0xff] }
 0x1d0   :  { %492 = vmatpush.msrb.mxu0 %v463_v10 }
 0x1d3   :  { %v570_v1 = vpop.f32.mrf.mxu1 }
 0x1d5   :  { %415 = vmatmul.f32.gmra.mxu3 %v1389_v17  ;;  %v462_v17 = vld [vmem:[#allocation8 + $0x50] sm:$0xff] }
 0x1d6   :  { %493 = vmatpush.msrb.mxu0 %v462_v17 }
 0x1db   :  { %v573_v5 = vpop.f32.mrf.mxu1 }
 0x1dd   :  { %418 = vmatmul.f32.gmra.mxu3 %v1397_v19  ;;  %v461_v19 = vld [vmem:[#allocation8 + $0x48] sm:$0xff] }
 0x1de   :  { %494 = vmatpush.msrb.mxu0 %v461_v19 }
 0x1e3   :  { %v576_v18 = vpop.f32.mrf.mxu1 }
 0x1e5   :  { %421 = vmatmul.f32.gmra.mxu3 %v1403_v21  ;;  %v460_v21 = vld [vmem:[#allocation8 + $0x40] sm:$0xff] }
 0x1e6   :  { %495 = vmatpush.msrb.mxu0 %v460_v21 }
 0x1eb   :  { %v579_v19 = vpop.f32.mrf.mxu1 }
 0x1ed   :  { %424 = vmatmul.f32.gmra.mxu3 %v1409_v23  ;;  %v459_v23 = vld [vmem:[#allocation8 + $0x38] sm:$0xff] }
 0x1ee   :  { %496 = vmatpush.msrb.mxu0 %v459_v23 }
 0x1f5   :  { %427 = vmatmul.f32.gmra.mxu3 %v1413_v24  ;;  %v458_v24 = vld [vmem:[#allocation8 + $0x30] sm:$0xff] }
 0x1f6   :  { %497 = vmatpush.msrb.mxu0 %v458_v24 }
 0x1fd   :  { %430 = vmatmul.f32.gmra.mxu3 %v1416_v25  ;;  %v457_v25 = vld [vmem:[#allocation8 + $0x28] sm:$0xff] }
 0x1fe   :  { %498 = vmatpush.msrb.mxu0 %v457_v25 }
 0x200   :  { %499 = vmatpush.msrb.mxu0 %v456_v7 }
 0x202   :  { %500 = vmatpush.msrb.mxu0 %v455_v32  ;;  %v582_v32 = vpop.f32.mrf.mxu1 }
 0x204   :  { %501 = vmatpush.msrb.mxu0 %v454_v39 }
 0x205   :  { %433 = vmatmul.f32.gmra.mxu3 %v1419_v26  ;;  %v452_v26 = vld [vmem:[#allocation8] sm:$0xff] }
 0x206   :  { %502 = vmatpush.msrb.mxu0 %v453_v40 }
 0x208   :  { %503 = vmatpush.msrb.mxu0 %v452_v26 }
 0x20d   :  { %436 = vmatmul.f32.gmra.mxu3 %v1422_v27 }
 0x215   :  { %439 = vmatmul.f32.gmra.mxu3 %v1435_v36 }
 0x21d   :  { %442 = vmatmul.f32.gmra.mxu3 %v1448_v45 }
 0x225   :  { %445 = vmatmul.f32.gmra.mxu3 %v1452_v54  ;;  %v649_v54 = vld [vmem:[#allocation10 + $0x78] sm:$0xff] }
 0x226   :  { %654 = vmatpush.msrb.mxu2 %v649_v54 }
 0x22d   :  { %448 = vmatmul.f32.gmra.mxu3 %v1455_v60  ;;  %v648_v60 = vld [vmem:[#allocation10 + $0x70] sm:$0xff] }
 0x22e   :  { %655 = vmatpush.msrb.mxu2 %v648_v60 }
 0x230   :  { %656 = vmatpush.msrb.mxu2 %v647_v52 }
 0x232   :  { %657 = vmatpush.msrb.mxu2 %v646_v55 }
 0x234   :  { %658 = vmatpush.msrb.mxu2 %v645_v41 }
 0x236   :  { %659 = vmatpush.msrb.mxu2 %v644_v61 }
 0x238   :  { %v404_v27 = vpop.f32.mrf.mxu3  ;;  %660 = vmatpush.msrb.mxu2 %v643_v63 }
 0x239   :  { %504 = vmatmul.f32.vlgmr.msrb.gmra.mxu0 %v404_v27 }
 0x23a   :  { %661 = vmatpush.msrb.mxu2 %v642_v49 }
 0x23c   :  { %662 = vmatpush.msrb.mxu2 %v641_v11 }
 0x23e   :  { %663 = vmatpush.msrb.mxu2 %v640_v62 }
 0x240   :  { %v407_v42 = vpop.f32.mrf.mxu3  ;;  %664 = vmatpush.msrb.mxu2 %v639_v8 }
 0x241   :  { %507 = vmatmul.f32.gmra.mxu0 %v407_v42 }
 0x242   :  { %665 = vmatpush.msrb.mxu2 %v638_v30 }
 0x244   :  { %666 = vmatpush.msrb.mxu2 %v637_v29 }
 0x246   :  { %667 = vmatpush.msrb.mxu2 %v636_v6 }
 0x248   :  { %v410_v43 = vpop.f32.mrf.mxu3  ;;  %668 = vmatpush.msrb.mxu2 %v635_v58 }
 0x249   :  { %510 = vmatmul.f32.gmra.mxu0 %v410_v43  ;;  %v585_v43 = vpop.f32.mrf.mxu1 }
 0x24a   :  { %669 = vmatpush.msrb.mxu2 %v634_v14 }
 0x250   :  { %v413_v46 = vpop.f32.mrf.mxu3 }
 0x251   :  { %513 = vmatmul.f32.gmra.mxu0 %v413_v46 }
 0x258   :  { %v416_v47 = vpop.f32.mrf.mxu3 }
 0x259   :  { %516 = vmatmul.f32.gmra.mxu0 %v416_v47 }
 0x260   :  { %v419_v36 = vpop.f32.mrf.mxu3 }
 0x261   :  { %519 = vmatmul.f32.gmra.mxu0 %v419_v36 }
 0x268   :  { %v422_v48 = vpop.f32.mrf.mxu3 }
 0x269   :  { %522 = vmatmul.f32.gmra.mxu0 %v422_v48  ;;  %v588_v48 = vpop.f32.mrf.mxu1 }
 0x270   :  { %v425_v34 = vpop.f32.mrf.mxu3 }
 0x271   :  { %525 = vmatmul.f32.gmra.mxu0 %v425_v34 }
 0x278   :  { %v428_v45 = vpop.f32.mrf.mxu3 }
 0x279   :  { %528 = vmatmul.f32.gmra.mxu0 %v428_v45 }
 0x280   :  { %v431_v51 = vpop.f32.mrf.mxu3 }
 0x281   :  { %531 = vmatmul.f32.gmra.mxu0 %v431_v51  ;;  %v591_v51 = vpop.f32.mrf.mxu1 }
 0x288   :  { %v434_v56 = vpop.f32.mrf.mxu3 }
 0x289   :  { %534 = vmatmul.f32.gmra.mxu0 %v434_v56  ;;  %v594_v56 = vpop.f32.mrf.mxu1 }
 0x290   :  { %v437_v9 = vpop.f32.mrf.mxu3 }
 0x291   :  { %537 = vmatmul.f32.gmra.mxu0 %v437_v9  ;;  %v597_v9 = vpop.f32.mrf.mxu1 }
 0x298   :  { %v440_v4 = vpop.f32.mrf.mxu3 }
 0x299   :  { %540 = vmatmul.f32.gmra.mxu0 %v440_v4  ;;  %v600_v6 = vpop.f32.mrf.mxu1 }
 0x2a0   :  { %v443_v33 = vpop.f32.mrf.mxu3 }
 0x2a1   :  { %543 = vmatmul.f32.gmra.mxu0 %v443_v33  ;;  %v603_v33 = vpop.f32.mrf.mxu1 }
 0x2a8   :  { %v446_v16 = vpop.f32.mrf.mxu3 }
 0x2a9   :  { %546 = vmatmul.f32.gmra.mxu0 %v446_v16 }
 0x2b0   :  { %v449_v20 = vpop.f32.mrf.mxu3 }
 0x2b1   :  { %549 = vmatmul.f32.gmra.mxu0 %v449_v20 }
 0x2b6   :  { %v505_v10 = vpop.f32.mrf.mxu0 }
 0x2b7   :  { %v506_v17 = vadd.f32 %v1591_v22, %v505_v10  ;;  %v606_v10 = vpop.f32.mrf.mxu1 }
 0x2b9   :  { %v571_v21 = vadd.f32 %v570_v1, %v506_v17 }
 0x2bb   :  { %v618_v23 = vadd.f32 %v571_v21, %v1491_v28 }
 0x2bd   :  { %670 = vmatmul.f32.vlgmr.msrb.gmra.mxu2 %v618_v23 }
 0x2be   :  { %v508_v24 = vpop.f32.mrf.mxu0 }
 0x2bf   :  { %v509_v25 = vadd.f32 %v1591_v22, %v508_v24  ;;  %v609_v24 = vpop.f32.mrf.mxu1 }
 0x2c1   :  { %v574_v7 = vadd.f32 %v573_v5, %v509_v25 }
 0x2c3   :  { %v619_v39 = vadd.f32 %v574_v7, %v1495_v31 }
 0x2c5   :  { %673 = vmatmul.f32.gmra.mxu2 %v619_v39 }
 0x2c6   :  { %v511_v40 = vpop.f32.mrf.mxu0 }
 0x2c7   :  { %v512_v26 = vadd.f32 %v1591_v22, %v511_v40  ;;  %v612_v39 = vpop.f32.mrf.mxu1 }
 0x2c9   :  { %v577_v27 = vadd.f32 %v576_v18, %v512_v26 }
 0x2cb   :  { %v620_v42 = vadd.f32 %v577_v27, %v1499_v15 }
 0x2cd   :  { %676 = vmatmul.f32.gmra.mxu2 %v620_v42 }
 0x2ce   :  { %v514_v46 = vpop.f32.mrf.mxu0 }
 0x2cf   :  { %v515_v28 = vadd.f32 %v1591_v22, %v514_v46 }
 0x2d1   :  { %v580_v47 = vadd.f32 %v579_v19, %v515_v28 }
 0x2d3   :  { %v621_v36 = vadd.f32 %v580_v47, %v1504_v12  ;;  %v719_v47 = vlaneseq }
 0x2d5   :  { %679 = vmatmul.f32.gmra.mxu2 %v621_v36  ;;  %v1625_v36 = vand.u32 127, %v719_v47 }
 0x2d6   :  { %v517_v34 = vpop.f32.mrf.mxu0 }
 0x2d7   :  { %v518_v31 = vadd.f32 %v1591_v22, %v517_v34  ;;  %vm721_vm0 = vcmp.lt.s32.totalorder %v1625_v36, 4 }
 0x2d9   :  { %v583_v45 = vadd.f32 %v582_v32, %v518_v31 }
 0x2db   :  { %v622_v54 = vadd.f32 %v583_v45, %v1508_v38 }
 0x2dd   :  { %682 = vmatmul.f32.gmra.mxu2 %v622_v54 }
 0x2de   :  { %v520_v60 = vpop.f32.mrf.mxu0 }
 0x2df   :  { %v521_v15 = vadd.f32 %v1591_v22, %v520_v60 }
 0x2e1   :  { %v586_v52 = vadd.f32 %v585_v43, %v521_v15  ;;  %v615_v43 = vpop.f32.mrf.mxu1 }
 0x2e3   :  { %v623_v55 = vadd.f32 %v586_v52, %v1512_v44 }
 0x2e5   :  { %685 = vmatmul.f32.gmra.mxu2 %v623_v55 }
 0x2e6   :  { %v523_v41 = vpop.f32.mrf.mxu0 }
 0x2e7   :  { %v524_v12 = vadd.f32 %v1591_v22, %v523_v41 }
 0x2e9   :  { %v589_v61 = vadd.f32 %v588_v48, %v524_v12 }
 0x2eb   :  { %v624_v63 = vadd.f32 %v589_v61, %v1516_v50 }
 0x2ed   :  { %688 = vmatmul.f32.gmra.mxu2 %v624_v63 }
 0x2ee   :  { %v526_v49 = vpop.f32.mrf.mxu0 }
 0x2ef   :  { %v527_v38 = vadd.f32 %v1591_v22, %v526_v49 }
 0x2f1   :  { %v592_v11 = vadd.f32 %v591_v51, %v527_v38 }
 0x2f3   :  { %v625_v62 = vadd.f32 %v592_v11, %v1521_v57 }
 0x2f5   :  { %691 = vmatmul.f32.gmra.mxu2 %v625_v62 }
 0x2f6   :  { %v529_v8 = vpop.f32.mrf.mxu0 }
 0x2f7   :  { %v530_v44 = vadd.f32 %v1591_v22, %v529_v8 }
 0x2f9   :  { %v595_v30 = vadd.f32 %v594_v56, %v530_v44 }
 0x2fb   :  { %v626_v29 = vadd.f32 %v595_v30, %v1528_v53 }
 0x2fd   :  { %694 = vmatmul.f32.gmra.mxu2 %v626_v29 }
 0x2fe   :  { %v532_v4 = vpop.f32.mrf.mxu0 }
 0x2ff   :  { %v533_v50 = vadd.f32 %v1591_v22, %v532_v4 }
 0x301   :  { %v598_v58 = vadd.f32 %v597_v9, %v533_v50 }
 0x303   :  { %v627_v14 = vadd.f32 %v598_v58, %v1546_v59 }
 0x305   :  { %697 = vmatmul.f32.gmra.mxu2 %v627_v14 }
 0x306   :  { %v535_v1 = vpop.f32.mrf.mxu0 }
 0x307   :  { %v536_v57 = vadd.f32 %v1591_v22, %v535_v1 }
 0x309   :  { %v601_v5 = vadd.f32 %v600_v6, %v536_v57 }
 0x30b   :  { %v628_v16 = vadd.f32 %v601_v5, %v1551_v37 }
 0x30d   :  { %700 = vmatmul.f32.gmra.mxu2 %v628_v16 }
 0x30e   :  { %v538_v18 = vpop.f32.mrf.mxu0 }
 0x30f   :  { %v539_v53 = vadd.f32 %v1591_v22, %v538_v18 }
 0x311   :  { %v604_v20 = vadd.f32 %v603_v33, %v539_v53 }
 0x313   :  { %v629_v17 = vadd.f32 %v604_v20, %v1548_v2 }
 0x315   :  { %703 = vmatmul.f32.gmra.mxu2 %v629_v17 }
 0x316   :  { %v541_v19 = vpop.f32.mrf.mxu0 }
 0x317   :  { %v542_v59 = vadd.f32 %v1591_v22, %v541_v19 }
 0x319   :  { %v607_v21 = vadd.f32 %v606_v10, %v542_v59 }
 0x31b   :  { %v630_v23 = vadd.f32 %v607_v21, %v1543_v0 }
 0x31d   :  { %706 = vmatmul.f32.gmra.mxu2 %v630_v23 }
 0x31e   :  { %v544_v25 = vpop.f32.mrf.mxu0 }
 0x31f   :  { %v545_v37 = vadd.f32 %v1591_v22, %v544_v25 }
 0x321   :  { %v610_v7 = vadd.f32 %v609_v24, %v545_v37 }
 0x323   :  { %v631_v32 = vadd.f32 %v610_v7, %v1540_v35  ;;  %v1630_v35 = vld [vmem:[%s1870_s7] ss:$0 sm:$0xff]  ;;  %s1249_s7 = smov [#allocation11]  }
 0x324   :  { %s950_s9 = sshll.u32 %s1249_s7, 4  ;;  %s951_s9 = int_to_ptr.vmem [resolvable:$true] %s950_s9 }
 0x325   :  { %709 = vmatmul.f32.gmra.mxu2 %v631_v32 }
 0x326   :  { %v547_v40 = vpop.f32.mrf.mxu0 }
 0x327   :  { %v548_v2 = vadd.f32 %v1591_v22, %v547_v40 }
 0x329   :  { %v613_v26 = vadd.f32 %v612_v39, %v548_v2 }
 0x32b   :  { %v632_v27 = vadd.f32 %v613_v26, %v1535_v13 }
 0x32d   :  { %712 = vmatmul.f32.gmra.mxu2 %v632_v27 }
 0x32e   :  { %v550_v42 = vpop.f32.mrf.mxu0 }
 0x32f   :  { %v551_v0 = vadd.f32 %v1591_v22, %v550_v42 }
 0x331   :  { %v616_v46 = vadd.f32 %v615_v43, %v551_v0 }
 0x333   :  { %v633_v28 = vadd.f32 %v616_v46, %v1532_v3 }
 0x335   :  { %715 = vmatmul.f32.gmra.mxu2 %v633_v28 }
 0x340   :  { %v671_v48 = vpop.f32.mrf.mxu2 }
 0x341   :  { %v672_v13 = vadd.f32 %v1630_v35, %v671_v48 }
 0x343   :  { %v1636_v22 = vsel %vm721_vm0, %v672_v13, -1e+30 }
 0x344   :  { %738 = vmax.xlane.f32.xlu0 %v1636_v22 }
 0x348   :  { %v674_v3 = vpop.f32.mrf.mxu2 }
 0x349   :  { %v675_v34 = vadd.f32 %v1630_v35, %v674_v3 }
 0x34b   :  { %v1642_v31 = vsel %vm721_vm0, %v675_v34, -1e+30 }
 0x34c   :  { %740 = vmax.xlane.f32.xlu0 %v1642_v31 }
 0x350   :  { %v677_v45 = vpop.f32.mrf.mxu2 }
 0x351   :  { %v678_v54 = vadd.f32 %v1630_v35, %v677_v45 }
 0x353   :  { %v1648_v60 = vsel %vm721_vm0, %v678_v54, -1e+30 }
 0x354   :  { %742 = vmax.xlane.f32.xlu1 %v1648_v60 }
 0x358   :  { %v680_v15 = vpop.f32.mrf.mxu2 }
 0x359   :  { %v681_v51 = vadd.f32 %v1630_v35, %v680_v15 }
 0x35b   :  { %v1654_v52 = vsel %vm721_vm0, %v681_v51, -1e+30 }
 0x35c   :  { %744 = vmax.xlane.f32.xlu1 %v1654_v52 }
 0x360   :  { %v683_v55 = vpop.f32.mrf.mxu2 }
 0x361   :  { %v684_v41 = vadd.f32 %v1630_v35, %v683_v55 }
 0x363   :  { %v1660_v12 = vsel %vm721_vm0, %v684_v41, -1e+30 }
 0x364   :  { %746 = vmax.xlane.f32.xlu2 %v1660_v12 }
 0x368   :  { %v686_v61 = vpop.f32.mrf.mxu2 }
 0x369   :  { %v687_v56 = vadd.f32 %v1630_v35, %v686_v61 }
 0x36b   :  { %v1666_v63 = vsel %vm721_vm0, %v687_v56, -1e+30 }
 0x36c   :  { %748 = vmax.xlane.f32.xlu2 %v1666_v63 }
 0x370   :  { %v689_v49 = vpop.f32.mrf.mxu2 }
 0x371   :  { %v690_v38 = vadd.f32 %v1630_v35, %v689_v49 }
 0x373   :  { %v1672_v11 = vsel %vm721_vm0, %v690_v38, -1e+30 }
 0x374   :  { %750 = vmax.xlane.f32.xlu0 %v1672_v11 }
 0x378   :  { %v692_v62 = vpop.f32.mrf.mxu2 }
 0x379   :  { %v693_v9 = vadd.f32 %v1630_v35, %v692_v62 }
 0x37b   :  { %v1678_v8 = vsel %vm721_vm0, %v693_v9, -1e+30 }
 0x37c   :  { %752 = vmax.xlane.f32.xlu1 %v1678_v8 }
 0x380   :  { %v695_v44 = vpop.f32.mrf.mxu2 }
 0x381   :  { %v696_v30 = vadd.f32 %v1630_v35, %v695_v44 }
 0x383   :  { %v1684_v29 = vsel %vm721_vm0, %v696_v30, -1e+30 }
 0x384   :  { %754 = vmax.xlane.f32.xlu2 %v1684_v29 }
 0x388   :  { %v698_v6 = vpop.f32.mrf.mxu2 }
 0x389   :  { %v699_v4 = vadd.f32 %v1630_v35, %v698_v6 }
 0x38b   :  { %v1690_v50 = vsel %vm721_vm0, %v699_v4, -1e+30 }
 0x38c   :  { %756 = vmax.xlane.f32.xlu0 %v1690_v50 }
 0x390   :  { %v701_v58 = vpop.f32.mrf.mxu2 }
 0x391   :  { %v702_v14 = vadd.f32 %v1630_v35, %v701_v58 }
 0x393   :  { %v1696_v1 = vsel %vm721_vm0, %v702_v14, -1e+30 }
 0x394   :  { %758 = vmax.xlane.f32.xlu1 %v1696_v1 }
 0x398   :  { %v704_v57 = vpop.f32.mrf.mxu2 }
 0x399   :  { %v705_v33 = vadd.f32 %v1630_v35, %v704_v57 }
 0x39b   :  { %v1702_v5 = vsel %vm721_vm0, %v705_v33, -1e+30 }
 0x39c   :  { %760 = vmax.xlane.f32.xlu2 %v1702_v5 }
 0x3a0   :  { %v707_v16 = vpop.f32.mrf.mxu2 }
 0x3a1   :  { %v708_v18 = vadd.f32 %v1630_v35, %v707_v16 }
 0x3a3   :  { %v1708_v53 = vsel %vm721_vm0, %v708_v18, -1e+30 }
 0x3a4   :  { %762 = vmax.xlane.f32.xlu0 %v1708_v53 }
 0x3a8   :  { %v710_v20 = vpop.f32.mrf.mxu2 }
 0x3a9   :  { %v711_v10 = vadd.f32 %v1630_v35, %v710_v20 }
 0x3ab   :  { %v1714_v17 = vsel %vm721_vm0, %v711_v10, -1e+30 }
 0x3ac   :  { %764 = vmax.xlane.f32.xlu1 %v1714_v17 }
 0x3b0   :  { %v713_v19 = vpop.f32.mrf.mxu2 }
 0x3b1   :  { %v714_v59 = vadd.f32 %v1630_v35, %v713_v19 }
 0x3b3   :  { %v1720_v21 = vsel %vm721_vm0, %v714_v59, -1e+30 }
 0x3b4   :  { %766 = vmax.xlane.f32.xlu2 %v1720_v21 }
 0x3b7   :  { %v1723_v23 = vpop.xlane.xlu0 %738 }
 0x3b8   :  { %v770_v24 = vsub.f32 %v1636_v22, %v1723_v23  ;;  %v716_v25 = vpop.f32.mrf.mxu2 }
 0x3b9   :  { %v717_v37 = vadd.f32 %v1630_v35, %v716_v25 }
 0x3ba   :  { %v786_v7 = vmul.f32 1.442695, %v770_v24 }
 0x3bb   :  { %v1730_v32 = vsel %vm721_vm0, %v717_v37, -1e+30 }
 0x3bc   :  { %1026 = vpow2.f32 %v786_v7  ;;  %768 = vmax.xlane.f32.xlu0 %v1730_v32 }
 0x3bf   :  { %v1733_v39 = vpop.xlane.xlu0 %740 }
 0x3c0   :  { %v771_v40 = vsub.f32 %v1642_v31, %v1733_v39 }
 0x3c2   :  { %v1027_v2 = vpop.eup %1026  ;;  %v788_v26 = vmul.f32 1.442695, %v771_v40 }
 0x3c3   :  { %v818_v27 = vsel %vm721_vm0, %v1027_v2, 0.0 }
 0x3c4   :  { %1028 = vpow2.f32 %v788_v26  ;;  %834 = vadd.xlane.f32.xlu1 %v818_v27 }
 0x3c7   :  { %v1739_v42 = vpop.xlane.xlu1 %742 }
 0x3c8   :  { %v772_v0 = vsub.f32 %v1648_v60, %v1739_v42 }
 0x3ca   :  { %v1029_v43 = vpop.eup %1028  ;;  %v790_v46 = vmul.f32 1.442695, %v772_v0 }
 0x3cb   :  { %v819_v28 = vsel %vm721_vm0, %v1029_v43, 0.0 }
 0x3cc   :  { %1030 = vpow2.f32 %v790_v46  ;;  %836 = vadd.xlane.f32.xlu2 %v819_v28 }
 0x3cf   :  { %v1745_v47 = vpop.xlane.xlu1 %744 }
 0x3d0   :  { %v773_v35 = vsub.f32 %v1654_v52, %v1745_v47 }
 0x3d2   :  { %v1031_v48 = vpop.eup %1030  ;;  %v792_v13 = vmul.f32 1.442695, %v773_v35 }
 0x3d3   :  { %v820_v3 = vsel %vm721_vm0, %v1031_v48, 0.0 }
 0x3d4   :  { %1032 = vpow2.f32 %v792_v13  ;;  %838 = vadd.xlane.f32.xlu0 %v820_v3 }
 0x3d7   :  { %v1751_v34 = vpop.xlane.xlu2 %746 }
 0x3d8   :  { %v774_v45 = vsub.f32 %v1660_v12, %v1751_v34 }
 0x3da   :  { %v1033_v54 = vpop.eup %1032  ;;  %v794_v15 = vmul.f32 1.442695, %v774_v45 }
 0x3db   :  { %v821_v51 = vsel %vm721_vm0, %v1033_v54, 0.0 }
 0x3dc   :  { %1034 = vpow2.f32 %v794_v15  ;;  %840 = vadd.xlane.f32.xlu1 %v821_v51 }
 0x3df   :  { %v1757_v55 = vpop.xlane.xlu2 %748 }
 0x3e0   :  { %v775_v41 = vsub.f32 %v1666_v63, %v1757_v55 }
 0x3e2   :  { %v1035_v61 = vpop.eup %1034  ;;  %v796_v56 = vmul.f32 1.442695, %v775_v41 }
 0x3e3   :  { %v822_v49 = vsel %vm721_vm0, %v1035_v61, 0.0 }
 0x3e4   :  { %1036 = vpow2.f32 %v796_v56  ;;  %842 = vadd.xlane.f32.xlu2 %v822_v49 }
 0x3e7   :  { %v1763_v38 = vpop.xlane.xlu0 %750 }
 0x3e8   :  { %v776_v62 = vsub.f32 %v1672_v11, %v1763_v38 }
 0x3ea   :  { %v1037_v9 = vpop.eup %1036  ;;  %v798_v44 = vmul.f32 1.442695, %v776_v62 }
 0x3eb   :  { %v823_v30 = vsel %vm721_vm0, %v1037_v9, 0.0 }
 0x3ec   :  { %1038 = vpow2.f32 %v798_v44  ;;  %844 = vadd.xlane.f32.xlu0 %v823_v30 }
 0x3ef   :  { %v1769_v6 = vpop.xlane.xlu1 %752 }
 0x3f0   :  { %v777_v4 = vsub.f32 %v1678_v8, %v1769_v6 }
 0x3f2   :  { %v1039_v58 = vpop.eup %1038  ;;  %v800_v14 = vmul.f32 1.442695, %v777_v4 }
 0x3f3   :  { %v824_v57 = vsel %vm721_vm0, %v1039_v58, 0.0 }
 0x3f4   :  { %1040 = vpow2.f32 %v800_v14  ;;  %846 = vadd.xlane.f32.xlu1 %v824_v57 }
 0x3f7   :  { %v1775_v33 = vpop.xlane.xlu2 %754 }
 0x3f8   :  { %v778_v16 = vsub.f32 %v1684_v29, %v1775_v33 }
 0x3fa   :  { %v1041_v18 = vpop.eup %1040  ;;  %v802_v20 = vmul.f32 1.442695, %v778_v16 }
 0x3fb   :  { %v825_v10 = vsel %vm721_vm0, %v1041_v18, 0.0 }
 0x3fc   :  { %1042 = vpow2.f32 %v802_v20  ;;  %848 = vadd.xlane.f32.xlu2 %v825_v10 }
 0x3ff   :  { %v1781_v19 = vpop.xlane.xlu0 %756 }
 0x400   :  { %v779_v59 = vsub.f32 %v1690_v50, %v1781_v19 }
 0x402   :  { %v1043_v24 = vpop.eup %1042  ;;  %v804_v25 = vmul.f32 1.442695, %v779_v59 }
 0x403   :  { %v826_v37 = vsel %vm721_vm0, %v1043_v24, 0.0 }
 0x404   :  { %1044 = vpow2.f32 %v804_v25  ;;  %850 = vadd.xlane.f32.xlu0 %v826_v37 }
 0x407   :  { %v1787_v7 = vpop.xlane.xlu1 %758 }
 0x408   :  { %v780_v40 = vsub.f32 %v1696_v1, %v1787_v7 }
 0x40a   :  { %v1045_v2 = vpop.eup %1044  ;;  %v806_v26 = vmul.f32 1.442695, %v780_v40 }
 0x40b   :  { %v827_v27 = vsel %vm721_vm0, %v1045_v2, 0.0 }
 0x40c   :  { %1046 = vpow2.f32 %v806_v26  ;;  %852 = vadd.xlane.f32.xlu1 %v827_v27 }
 0x40f   :  { %v1793_v0 = vpop.xlane.xlu2 %760 }
 0x410   :  { %v781_v43 = vsub.f32 %v1702_v5, %v1793_v0 }
 0x412   :  { %v1047_v46 = vpop.eup %1046  ;;  %v808_v28 = vmul.f32 1.442695, %v781_v43 }
 0x413   :  { %v828_v35 = vsel %vm721_vm0, %v1047_v46, 0.0 }
 0x414   :  { %1048 = vpow2.f32 %v808_v28  ;;  %854 = vadd.xlane.f32.xlu2 %v828_v35 }
 0x417   :  { %v1799_v48 = vpop.xlane.xlu0 %762 }
 0x418   :  { %v782_v13 = vsub.f32 %v1708_v53, %v1799_v48 }
 0x41a   :  { %v1049_v3 = vpop.eup %1048  ;;  %v810_v45 = vmul.f32 1.442695, %v782_v13 }
 0x41b   :  { %v829_v54 = vsel %vm721_vm0, %v1049_v3, 0.0 }
 0x41c   :  { %1050 = vpow2.f32 %v810_v45  ;;  %856 = vadd.xlane.f32.xlu0 %v829_v54 }
 0x41f   :  { %v1805_v15 = vpop.xlane.xlu1 %764 }
 0x420   :  { %v783_v51 = vsub.f32 %v1714_v17, %v1805_v15 }
 0x422   :  { %v1051_v41 = vpop.eup %1050  ;;  %v812_v61 = vmul.f32 1.442695, %v783_v51 }
 0x423   :  { %v830_v56 = vsel %vm721_vm0, %v1051_v41, 0.0 }
 0x424   :  { %1052 = vpow2.f32 %v812_v61  ;;  %858 = vadd.xlane.f32.xlu1 %v830_v56 }
 0x427   :  { %v1811_v49 = vpop.xlane.xlu2 %766 }
 0x428   :  { %v784_v62 = vsub.f32 %v1720_v21, %v1811_v49 }
 0x42a   :  { %v1053_v9 = vpop.eup %1052  ;;  %v814_v44 = vmul.f32 1.442695, %v784_v62 }
 0x42b   :  { %v831_v30 = vsel %vm721_vm0, %v1053_v9, 0.0 }
 0x42c   :  { %1054 = vpow2.f32 %v814_v44  ;;  %860 = vadd.xlane.f32.xlu2 %v831_v30 }
 0x42f   :  { %v1817_v4 = vpop.xlane.xlu0 %768 }
 0x430   :  { %v785_v58 = vsub.f32 %v1730_v32, %v1817_v4 }
 0x432   :  { %v1055_v14 = vpop.eup %1054  ;;  %v816_v57 = vmul.f32 1.442695, %v785_v58 }
 0x433   :  { %v832_v16 = vsel %vm721_vm0, %v1055_v14, 0.0 }
 0x434   :  { %1056 = vpow2.f32 %v816_v57  ;;  %862 = vadd.xlane.f32.xlu0 %v832_v16 }
 0x437   :  { %v835_v18 = vpop.xlane.xlu1 %834 }
 0x438   :  { %1058 = vlog2.f32 %v835_v18 }
 0x43a   :  { %v1057_v20 = vpop.eup %1056 }
 0x43b   :  { %v833_v10 = vsel %vm721_vm0, %v1057_v20, 0.0 }
 0x43c   :  { %864 = vadd.xlane.f32.xlu1 %v833_v10 }
 0x43e   :  { %v1059_v59 = vpop.eup %1058 }
 0x43f   :  { %v867_v24 = vmul.f32 0.6931472, %v1059_v59  ;;  %v837_v25 = vpop.xlane.xlu2 %836 }
 0x440   :  { %1060 = vlog2.f32 %v837_v25 }
 0x441   :  { %v898_v37 = vadd.f32 %v867_v24, %v1723_v23 }
 0x443   :  { %v914_v40 = vsub.f32 %v1636_v22, %v898_v37 }
 0x445   :  { %930 = vst [vmem:[#allocation11] sm:$0xff] %v914_v40 }
 0x446   :  { %v1061_v2 = vpop.eup %1060 }
 0x447   :  { %v869_v26 = vmul.f32 0.6931472, %v1061_v2  ;;  %v839_v27 = vpop.xlane.xlu0 %838 }
 0x448   :  { %1062 = vlog2.f32 %v839_v27 }
 0x449   :  { %v899_v43 = vadd.f32 %v869_v26, %v1733_v39 }
 0x44b   :  { %v915_v46 = vsub.f32 %v1642_v31, %v899_v43 }
 0x44d   :  { %931 = vst [vmem:[#allocation11 + $0x8] sm:$0xff] %v915_v46 }
 0x44e   :  { %v1063_v36 = vpop.eup %1062 }
 0x44f   :  { %v871_v28 = vmul.f32 0.6931472, %v1063_v36  ;;  %v841_v35 = vpop.xlane.xlu1 %840 }
 0x450   :  { %1064 = vlog2.f32 %v841_v35 }
 0x451   :  { %v900_v13 = vadd.f32 %v871_v28, %v1739_v42 }
 0x453   :  { %v916_v23 = vsub.f32 %v1648_v60, %v900_v13 }
 0x455   :  { %932 = vst [vmem:[#allocation11 + $0x10] sm:$0xff] %v916_v23 }
 0x456   :  { %v1065_v22 = vpop.eup %1064 }
 0x457   :  { %v873_v3 = vmul.f32 0.6931472, %v1065_v22  ;;  %v843_v45 = vpop.xlane.xlu2 %842 }
 0x458   :  { %1066 = vlog2.f32 %v843_v45 }
 0x459   :  { %v901_v54 = vadd.f32 %v873_v3, %v1745_v47 }
 0x45b   :  { %v917_v39 = vsub.f32 %v1654_v52, %v901_v54 }
 0x45d   :  { %933 = vst [vmem:[#allocation11 + $0x18] sm:$0xff] %v917_v39 }
 0x45e   :  { %v1067_v31 = vpop.eup %1066 }
 0x45f   :  { %v875_v51 = vmul.f32 0.6931472, %v1067_v31  ;;  %v845_v41 = vpop.xlane.xlu0 %844 }
 0x460   :  { %1068 = vlog2.f32 %v845_v41 }
 0x461   :  { %v902_v61 = vadd.f32 %v875_v51, %v1751_v34 }
 0x463   :  { %v918_v42 = vsub.f32 %v1660_v12, %v902_v61 }
 0x465   :  { %934 = vst [vmem:[#allocation11 + $0x20] sm:$0xff] %v918_v42 }
 0x466   :  { %v1069_v60 = vpop.eup %1068 }
 0x467   :  { %v877_v56 = vmul.f32 0.6931472, %v1069_v60  ;;  %v847_v62 = vpop.xlane.xlu1 %846 }
 0x468   :  { %1070 = vlog2.f32 %v847_v62 }
 0x469   :  { %v903_v9 = vadd.f32 %v877_v56, %v1757_v55 }
 0x46b   :  { %v919_v47 = vsub.f32 %v1666_v63, %v903_v9 }
 0x46d   :  { %935 = vst [vmem:[#allocation11 + $0x28] sm:$0xff] %v919_v47 }
 0x46e   :  { %v1071_v52 = vpop.eup %1070 }
 0x46f   :  { %v879_v44 = vmul.f32 0.6931472, %v1071_v52  ;;  %v849_v30 = vpop.xlane.xlu2 %848 }
 0x470   :  { %1072 = vlog2.f32 %v849_v30 }
 0x471   :  { %v904_v58 = vadd.f32 %v879_v44, %v1763_v38 }
 0x473   :  { %v920_v34 = vsub.f32 %v1672_v11, %v904_v58 }
 0x475   :  { %936 = vst [vmem:[#allocation11 + $0x30] sm:$0xff] %v920_v34 }
 0x476   :  { %v1073_v12 = vpop.eup %1072 }
 0x477   :  { %v881_v14 = vmul.f32 0.6931472, %v1073_v12  ;;  %v851_v57 = vpop.xlane.xlu0 %850 }
 0x478   :  { %1074 = vlog2.f32 %v851_v57 }
 0x479   :  { %v905_v16 = vadd.f32 %v881_v14, %v1769_v6 }
 0x47b   :  { %v921_v55 = vsub.f32 %v1678_v8, %v905_v16 }
 0x47d   :  { %937 = vst [vmem:[#allocation11 + $0x38] sm:$0xff] %v921_v55 }
 0x47e   :  { %v1075_v63 = vpop.eup %1074 }
 0x47f   :  { %v883_v18 = vmul.f32 0.6931472, %v1075_v63  ;;  %v853_v20 = vpop.xlane.xlu1 %852 }
 0x480   :  { %1076 = vlog2.f32 %v853_v20 }
 0x481   :  { %v906_v10 = vadd.f32 %v883_v18, %v1775_v33 }
 0x483   :  { %v922_v38 = vsub.f32 %v1684_v29, %v906_v10 }
 0x485   :  { %938 = vst [vmem:[#allocation11 + $0x40] sm:$0xff] %v922_v38 }
 0x486   :  { %v1077_v11 = vpop.eup %1076 }
 0x487   :  { %v885_v59 = vmul.f32 0.6931472, %v1077_v11  ;;  %v855_v24 = vpop.xlane.xlu2 %854 }
 0x488   :  { %1078 = vlog2.f32 %v855_v24 }
 0x489   :  { %v907_v25 = vadd.f32 %v885_v59, %v1781_v19 }
 0x48b   :  { %v923_v6 = vsub.f32 %v1690_v50, %v907_v25 }
 0x48d   :  { %939 = vst [vmem:[#allocation11 + $0x48] sm:$0xff] %v923_v6 }
 0x48e   :  { %v1079_v8 = vpop.eup %1078 }
 0x48f   :  { %v887_v37 = vmul.f32 0.6931472, %v1079_v8  ;;  %v857_v40 = vpop.xlane.xlu0 %856 }
 0x490   :  { %1080 = vlog2.f32 %v857_v40 }
 0x491   :  { %v908_v2 = vadd.f32 %v887_v37, %v1787_v7 }
 0x493   :  { %v924_v33 = vsub.f32 %v1696_v1, %v908_v2 }
 0x495   :  { %940 = vst [vmem:[#allocation11 + $0x50] sm:$0xff] %v924_v33 }
 0x496   :  { %v1081_v29 = vpop.eup %1080 }
 0x497   :  { %v889_v26 = vmul.f32 0.6931472, %v1081_v29  ;;  %v859_v27 = vpop.xlane.xlu1 %858 }
 0x498   :  { %1082 = vlog2.f32 %v859_v27 }
 0x499   :  { %v909_v43 = vadd.f32 %v889_v26, %v1793_v0 }
 0x49b   :  { %v925_v19 = vsub.f32 %v1702_v5, %v909_v43 }
 0x49d   :  { %941 = vst [vmem:[#allocation11 + $0x58] sm:$0xff] %v925_v19 }
 0x49e   :  { %v1083_v50 = vpop.eup %1082 }
 0x49f   :  { %v891_v46 = vmul.f32 0.6931472, %v1083_v50  ;;  %v861_v36 = vpop.xlane.xlu2 %860 }
 0x4a0   :  { %1084 = vlog2.f32 %v861_v36 }
 0x4a1   :  { %v910_v28 = vadd.f32 %v891_v46, %v1799_v48 }
 0x4a3   :  { %v926_v7 = vsub.f32 %v1708_v53, %v910_v28 }
 0x4a5   :  { %942 = vst [vmem:[#allocation11 + $0x60] sm:$0xff] %v926_v7 }
 0x4a6   :  { %v1085_v1 = vpop.eup %1084 }
 0x4a7   :  { %v893_v35 = vmul.f32 0.6931472, %v1085_v1  ;;  %v863_v13 = vpop.xlane.xlu0 %862 }
 0x4a8   :  { %1086 = vlog2.f32 %v863_v13 }
 0x4a9   :  { %v911_v23 = vadd.f32 %v893_v35, %v1805_v15 }
 0x4ab   :  { %v927_v0 = vsub.f32 %v1714_v17, %v911_v23 }
 0x4ad   :  { %943 = vst [vmem:[#allocation11 + $0x68] sm:$0xff] %v927_v0 }
 0x4ae   :  { %v1087_v5 = vpop.eup %1086 }
 0x4af   :  { %v895_v22 = vmul.f32 0.6931472, %v1087_v5  ;;  %v865_v3 = vpop.xlane.xlu1 %864 }
 0x4b0   :  { %1088 = vlog2.f32 %v865_v3 }
 0x4b1   :  { %v912_v45 = vadd.f32 %v895_v22, %v1811_v49 }
 0x4b3   :  { %v928_v48 = vsub.f32 %v1720_v21, %v912_v45 }
 0x4b5   :  { %944 = vst [vmem:[#allocation11 + $0x70] sm:$0xff] %v928_v48 }
 0x4b6   :  { %v1089_v53 = vpop.eup %1088 }
 0x4b7   :  { %v897_v54 = vmul.f32 0.6931472, %v1089_v53 }
 0x4b9   :  { %v913_v17 = vadd.f32 %v897_v54, %v1817_v4 }
 0x4bb   :  { %v929_v15 = vsub.f32 %v1730_v32, %v913_v17 }
 0x4bd   :  { %945 = vst [vmem:[#allocation11 + $0x78] sm:$0xff] %v929_v15 }
 0x4be   :  { %958 = dma.vmem_to_hbm [thread:$0]  %s951_s9, 2048, %s953_s12, [#allocation4], %s1243_s13, %s1243_s13, %s1244_s14  }
 0x4bf   :  { %1240 = dma.done.wait [#allocation4], 2048  }
 0x4c0   :  { %1241 = vsyncadd [#allocation4], 4294965248 }
 0x4c1   :  { %963 = vsyncpa [#allocation3], 1 }
 0x4c2   :  { %964 = vsyncpa [#allocation6], 1 }
 0x4c3   :  { %965 = vsyncpa [#allocation9], 1 }
 0x4c4   :  { %966 = vsyncpa [#allocation4], 1 }

</bundles_post_ra>
